<compile_context>
chip_gen: v7x
topology: tpu7x:2x2x1
jax: 0.10.0
libtpu: 0.0.40
codegen_flags: <defaults>
</compile_context>

<pallas_src>
import jax
import jax.numpy as jnp
from jax import lax
from jax.experimental import pallas as pl
from jax.experimental.pallas import tpu as pltpu


# ----------------------------- VMEM accounting -----------------------------

def _pad_dims_bytes(shape, itemsize):
    """Lane/sublane-padded VMEM footprint of one array."""
    dims = list(shape)
    if len(dims) >= 1:
        dims[-1] = -(-dims[-1] // 128) * 128
    if len(dims) >= 2:
        sub = 8 * max(1, 4 // itemsize)           # 8 sublanes f32, 16 bf16
        dims[-2] = -(-dims[-2] // sub) * sub
    n = 1
    for d in dims:
        n *= int(d)
    return n * itemsize


def _tile_working_set_bytes(TH, W, Cin, Cout, r, out_itemsize):
    """Per-tile VMEM: double-buffered output block + in-kernel temporaries."""
    out_tile = 2 * _pad_dims_bytes((TH * r, W, r * Cin), out_itemsize)
    lhs = _pad_dims_bytes((TH * W, 3 * Cin), 2)          # bf16 im2col row slice
    acc = _pad_dims_bytes((TH * W, Cout), 4)             # f32 acc / bias / prelu
    shuffle = _pad_dims_bytes((TH * r, W, r * Cin), 4)   # stacked shuffle temp
    return out_tile + lhs + 3 * acc + shuffle


def _vmem_capacity_bytes():
    try:
        return int(pltpu.get_tpu_info().vmem_capacity_bytes)
    except Exception:
        return 128 << 20


def _pick_tile_h(H, W, Cin, Cout, r, out_itemsize, budget_bytes):
    """Largest divisor of H (preferring multiples of 8, capped at H//2 so both
    v7x TensorCores get work at batch 1) whose working set fits the budget."""
    cap = max(1, H // 2)
    cands = [th for th in range(1, cap + 1) if H % th == 0]
    aligned = [th for th in cands if th % 8 == 0]
    pool = aligned if aligned else cands
    best = pool[0]
    for th in pool:
        if (th > best and
                _tile_working_set_bytes(th, W, Cin, Cout, r, out_itemsize)
                <= budget_bytes):
            best = th
    return best


# --------------------------------- kernel ----------------------------------

def _make_kernel(TH, W, Cin, Cout, r):
    rCin = r * Cin

    def kernel(x_ref, w_ref, b_ref, a_ref, o_ref):
        # x_ref : (1, H+2, W, 3*Cin) bf16  kx-prepacked padded image (resident per n)
        # w_ref : (3, 3*Cin, Cout)   bf16  per-ky weights, rows=(kx,cin), cols=(i,j,c)
        # b_ref : (1, Cout) f32            bias   (channel order (i, j, c))
        # a_ref : (1, Cout) f32            PReLU slope expanded to conv channels
        # o_ref : (1, TH*r, W, r*Cin)      pixel-shuffled output rows of this tile
        t = pl.program_id(1)
        row0 = t * TH
        if TH % 8 == 0:
            row0 = pl.multiple_of(row0, 8)

        # 3 dots (one per ky), f32 accumulation on the MXU.  Each lhs is an
        # aligned whole-row window; no concat / per-tile cast temporaries.
        acc = None
        for ky in range(3):
            lhs = x_ref[0, pl.ds(row0 + ky, TH), :, :].reshape(TH * W, 3 * Cin)
            p = jnp.dot(lhs, w_ref[ky], preferred_element_type=jnp.float32)
            acc = p if acc is None else acc + p

        y = acc + b_ref[...]                                   # single bias add
        y = jnp.where(y > 0, y, y * a_ref[...])                # PReLU (f32)

        # Fused PixelShuffle: (TH, W, r*rCin) -> (TH, r, W, rCin) -> (TH*r, W, rCin)
        y3 = y.reshape(TH, W, Cout)
        parts = [y3[:, :, i * rCin:(i + 1) * rCin] for i in range(r)]  # lane slices
        ysh = jnp.stack(parts, axis=1)                          # (TH, r, W, rCin)
        o_ref[0] = ysh.reshape(TH * r, W, rCin).astype(o_ref.dtype)

    return kernel


# -------------------------------- wrapper -----------------------------------

def upsample_block(x_nchw, weight_oihw, bias, alpha, scale_factor, *,
                   tile_h=None, mxu_dtype=jnp.bfloat16, out_dtype=jnp.float32):
    """Forward pass of UpsampleBlock.  x_nchw: (N, Cin, H, W) float32.
    Returns (N, Cin, H*r, W*r) in `out_dtype` (NCHW, matching PyTorch)."""
    N, Cin, H, W = x_nchw.shape
    r = int(scale_factor)
    Cout = Cin * r * r
    assert weight_oihw.shape == (Cout, Cin, 3, 3)
    assert bias.shape == (Cout,)
    assert alpha.shape == (Cin,)

    out_itemsize = jnp.dtype(out_dtype).itemsize
    cap = _vmem_capacity_bytes()
    tile_budget = min(16 << 20, max(2 << 20, cap // 8))
    if tile_h is None:
        tile_h = _pick_tile_h(H, W, Cin, Cout, r, out_itemsize, tile_budget)
    assert H % tile_h == 0, (H, tile_h)

    # ---- layout prep (one-shot XLA ops on the small input / tiny params) ----
    x_nhwc = jnp.transpose(x_nchw, (0, 2, 3, 1)).astype(mxu_dtype)
    x_pad = jnp.pad(x_nhwc, ((0, 0), (1, 1), (1, 1), (0, 0)))        # (N,H+2,W+2,Cin)
    # kx im2col pre-pack: x_pack[n,h,w,kx*Cin+c] = x_pad[n,h,w+kx,c]
    x_pack = jnp.concatenate([x_pad[:, :, kx:kx + W, :] for kx in range(3)],
                             axis=-1)                                 # (N,H+2,W,3*Cin)

    # Weights: permute conv-out channels (c,i,j)->(i,j,c), pack taps as
    # w_mat[ky, kx*Cin+cin, i*r*Cin+j*Cin+c].
    w_perm = weight_oihw.reshape(Cin, r, r, Cin, 3, 3)                # (c,i,j,cin,ky,kx)
    w_perm = jnp.transpose(w_perm, (4, 5, 3, 1, 2, 0))                # (ky,kx,cin,i,j,c)
    w_mat = w_perm.reshape(3, 3 * Cin, Cout).astype(mxu_dtype)

    b_perm = jnp.transpose(bias.reshape(Cin, r, r), (1, 2, 0)).reshape(1, Cout)
    b_perm = b_perm.astype(jnp.float32)
    a_perm = jnp.tile(alpha, r * r).reshape(1, Cout).astype(jnp.float32)

    kernel = _make_kernel(tile_h, W, Cin, Cout, r)

    # Generation-aware VMEM limit: resident input + weights + tile working set.
    est = (2 * _pad_dims_bytes((1, H + 2, W, 3 * Cin), 2)
           + 2 * _pad_dims_bytes((3, 3 * Cin, Cout), 2)
           + 4 * _pad_dims_bytes((1, Cout), 4)
           + _tile_working_set_bytes(tile_h, W, Cin, Cout, r, out_itemsize)
           + (2 << 20))
    vmem_limit = int(min(max(est, 8 << 20), int(cap * 0.8)))

    conv_ps = pl.pallas_call(
        kernel,
        out_shape=jax.ShapeDtypeStruct((N, H * r, W, r * Cin), out_dtype),
        grid_spec=pltpu.PrefetchScalarGridSpec(
            num_scalar_prefetch=0,
            grid=(N, H // tile_h),
            in_specs=[
                # Full prepacked image per n (index_map ignores t -> resident).
                pl.BlockSpec((1, H + 2, W, 3 * Cin), lambda n, t: (n, 0, 0, 0)),
                pl.BlockSpec((3, 3 * Cin, Cout), lambda n, t: (0, 0, 0)),
                pl.BlockSpec((1, Cout), lambda n, t: (0, 0)),
                pl.BlockSpec((1, Cout), lambda n, t: (0, 0)),
            ],
            out_specs=pl.BlockSpec((1, tile_h * r, W, r * Cin),
                                   lambda n, t: (n, t, 0, 0)),
        ),
        compiler_params=pltpu.CompilerParams(
            dimension_semantics=("parallel", "parallel"),
            vmem_limit_bytes=vmem_limit,
        ),
    )(x_pack, w_mat, b_perm, a_perm)

    # PixelShuffle already done in-kernel: only a free, contiguity-preserving
    # reshape remains.  NHWC consumers can stop at `y`.
    y = conv_ps.reshape(N, H * r, W * r, Cin)
    return jnp.transpose(y, (0, 3, 1, 2))       # NCHW parity with PyTorch


# ------------------------------- reference ----------------------------------

def _reference(x_nchw, weight_oihw, bias, alpha, r):
    """Pure-JAX reference matching PyTorch semantics (conv -> shuffle -> PReLU)."""
    N, Cin, H, W = x_nchw.shape
    Cout = Cin * r * r
    conv = lax.conv_general_dilated(
        x_nchw, weight_oihw,
        window_strides=(1, 1), padding=((1, 1), (1, 1)),
        dimension_numbers=("NCHW", "OIHW", "NCHW"),
        precision=lax.Precision.HIGHEST,
    ) + bias.reshape(1, Cout, 1, 1)
    y = conv.reshape(N, Cin, r, r, H, W)
    y = jnp.transpose(y, (0, 1, 4, 2, 5, 3)).reshape(N, Cin, H * r, W * r)
    a = alpha.reshape(1, Cin, 1, 1)
    return jnp.where(y > 0, y, y * a)


if __name__ == "__main__":
    key = jax.random.PRNGKey(0)
    k1, k2, k3, k4 = jax.random.split(key, 4)

    N, Cin, H, W = 2, 4, 16, 16
    scale = 2
    Cout = Cin * scale * scale

    x = jax.random.normal(k1, (N, Cin, H, W), dtype=jnp.float32)
    weight = 0.1 * jax.random.normal(k2, (Cout, Cin, 3, 3), dtype=jnp.float32)
    bias = 0.1 * jax.random.normal(k3, (Cout,), dtype=jnp.float32)
    alpha = 0.25 * jnp.ones((Cin,), dtype=jnp.float32) + \
        0.05 * jax.random.normal(k4, (Cin,), dtype=jnp.float32)

    out = upsample_block(x, weight, bias, alpha, scale)
    out = jax.block_until_ready(out)

    # Reference built from the same bf16-rounded MXU operands (kernel feeds the
    # MXU bf16 with f32 accumulation); bias / PReLU are exact f32 in both.
    xq = x.astype(jnp.bfloat16).astype(jnp.float32)
    wq = weight.astype(jnp.bfloat16).astype(jnp.float32)
    ref = _reference(xq, wq, bias, alpha, scale)

    assert out.shape == (N, Cin, H * scale, W * scale), out.shape
    max_err = float(jnp.max(jnp.abs(out - ref)))
    assert jnp.allclose(out, ref, atol=1e-3, rtol=1e-3), max_err

    print("KERNEL_OK")
</pallas_src>

<mosaic_0001>
module attributes {stable_mosaic.version = 11 : i64} {
  func.func @kernel(%arg0: i32, %arg1: i32, %arg2: memref<1x18x16x12xbf16, #tpu.memory_space<vmem>>, %arg3: memref<3x12x16xbf16, #tpu.memory_space<vmem>>, %arg4: memref<1x16xf32, #tpu.memory_space<vmem>>, %arg5: memref<1x16xf32, #tpu.memory_space<vmem>>, %arg6: memref<1x16x16x8xf32, #tpu.memory_space<vmem>>) attributes {dimension_semantics = [#tpu.dimension_semantics<parallel>, #tpu.dimension_semantics<parallel>], iteration_bounds = array<i64: 2, 2>, scalar_prefetch = 0 : i64, scratch_operands = 0 : i64, tpu.core_type = #tpu.core_type<tc>, window_params = [{transform_indices = @transform_0, window_bounds = array<i64: 1, 18, 16, 12>}, {pipeline_mode = #tpu.pipeline_mode<synchronous>, transform_indices = @transform_1, window_bounds = array<i64: 3, 12, 16>}, {pipeline_mode = #tpu.pipeline_mode<synchronous>, transform_indices = @transform_2, window_bounds = array<i64: 1, 16>}, {pipeline_mode = #tpu.pipeline_mode<synchronous>, transform_indices = @transform_3, window_bounds = array<i64: 1, 16>}, {transform_indices = @transform_4, window_bounds = array<i64: 1, 16, 16, 8>}]} {
    %c8_i32 = arith.constant 8 : i32
    %0 = arith.muli %arg1, %c8_i32 : i32
    %1 = tpu.assume_multiple %0, 8 : i32
    %c0_i32 = arith.constant 0 : i32
    %2 = arith.addi %1, %c0_i32 : i32
    %c0 = arith.constant 0 : index
    %3 = arith.index_cast %2 : i32 to index
    %c0_0 = arith.constant 0 : index
    %c0_1 = arith.constant 0 : index
    %4 = vector.load %arg2[%c0, %3, %c0_0, %c0_1] : memref<1x18x16x12xbf16, #tpu.memory_space<vmem>>, vector<1x8x16x12xbf16>
    %5 = vector.shape_cast %4 : vector<1x8x16x12xbf16> to vector<8x16x12xbf16>
    %6 = vector.shape_cast %5 : vector<8x16x12xbf16> to vector<128x12xbf16>
    %c0_2 = arith.constant 0 : index
    %c0_3 = arith.constant 0 : index
    %c0_4 = arith.constant 0 : index
    %7 = vector.load %arg3[%c0_2, %c0_3, %c0_4] : memref<3x12x16xbf16, #tpu.memory_space<vmem>>, vector<1x12x16xbf16>
    %8 = vector.shape_cast %7 : vector<1x12x16xbf16> to vector<12x16xbf16>
    %cst = arith.constant dense<0.000000e+00> : vector<128x16xf32>
    %9 = tpu.matmul %6, %8, %cst {dimension_numbers = #tpu.dot_dimension_numbers<[1], [0], [0], [1], [0, 0, 1, 1], [], []>} : vector<128x12xbf16>, vector<12x16xbf16>, vector<128x16xf32> -> vector<128x16xf32>
    %c1_i32 = arith.constant 1 : i32
    %10 = arith.addi %1, %c1_i32 : i32
    %c0_5 = arith.constant 0 : index
    %11 = arith.index_cast %10 : i32 to index
    %c0_6 = arith.constant 0 : index
    %c0_7 = arith.constant 0 : index
    %12 = vector.load %arg2[%c0_5, %11, %c0_6, %c0_7] : memref<1x18x16x12xbf16, #tpu.memory_space<vmem>>, vector<1x8x16x12xbf16>
    %13 = vector.shape_cast %12 : vector<1x8x16x12xbf16> to vector<8x16x12xbf16>
    %14 = vector.shape_cast %13 : vector<8x16x12xbf16> to vector<128x12xbf16>
    %c1 = arith.constant 1 : index
    %c0_8 = arith.constant 0 : index
    %c0_9 = arith.constant 0 : index
    %15 = vector.load %arg3[%c1, %c0_8, %c0_9] : memref<3x12x16xbf16, #tpu.memory_space<vmem>>, vector<1x12x16xbf16>
    %16 = vector.shape_cast %15 : vector<1x12x16xbf16> to vector<12x16xbf16>
    %cst_10 = arith.constant dense<0.000000e+00> : vector<128x16xf32>
    %17 = tpu.matmul %14, %16, %cst_10 {dimension_numbers = #tpu.dot_dimension_numbers<[1], [0], [0], [1], [0, 0, 1, 1], [], []>} : vector<128x12xbf16>, vector<12x16xbf16>, vector<128x16xf32> -> vector<128x16xf32>
    %18 = arith.addf %9, %17 : vector<128x16xf32>
    %c2_i32 = arith.constant 2 : i32
    %19 = arith.addi %1, %c2_i32 : i32
    %c0_11 = arith.constant 0 : index
    %20 = arith.index_cast %19 : i32 to index
    %c0_12 = arith.constant 0 : index
    %c0_13 = arith.constant 0 : index
    %21 = vector.load %arg2[%c0_11, %20, %c0_12, %c0_13] : memref<1x18x16x12xbf16, #tpu.memory_space<vmem>>, vector<1x8x16x12xbf16>
    %22 = vector.shape_cast %21 : vector<1x8x16x12xbf16> to vector<8x16x12xbf16>
    %23 = vector.shape_cast %22 : vector<8x16x12xbf16> to vector<128x12xbf16>
    %c2 = arith.constant 2 : index
    %c0_14 = arith.constant 0 : index
    %c0_15 = arith.constant 0 : index
    %24 = vector.load %arg3[%c2, %c0_14, %c0_15] : memref<3x12x16xbf16, #tpu.memory_space<vmem>>, vector<1x12x16xbf16>
    %25 = vector.shape_cast %24 : vector<1x12x16xbf16> to vector<12x16xbf16>
    %cst_16 = arith.constant dense<0.000000e+00> : vector<128x16xf32>
    %26 = tpu.matmul %23, %25, %cst_16 {dimension_numbers = #tpu.dot_dimension_numbers<[1], [0], [0], [1], [0, 0, 1, 1], [], []>} : vector<128x12xbf16>, vector<12x16xbf16>, vector<128x16xf32> -> vector<128x16xf32>
    %27 = arith.addf %18, %26 : vector<128x16xf32>
    %c0_17 = arith.constant 0 : index
    %c0_18 = arith.constant 0 : index
    %28 = vector.load %arg4[%c0_17, %c0_18] : memref<1x16xf32, #tpu.memory_space<vmem>>, vector<1x16xf32>
    %29 = vector.broadcast %28 : vector<1x16xf32> to vector<128x16xf32>
    %30 = arith.addf %27, %29 : vector<128x16xf32>
    %cst_19 = arith.constant 0.000000e+00 : f32
    %31 = vector.broadcast %cst_19 : f32 to vector<128x16xf32>
    %32 = arith.cmpf ogt, %30, %31 : vector<128x16xf32>
    %c0_20 = arith.constant 0 : index
    %c0_21 = arith.constant 0 : index
    %33 = vector.load %arg5[%c0_20, %c0_21] : memref<1x16xf32, #tpu.memory_space<vmem>>, vector<1x16xf32>
    %34 = vector.broadcast %33 : vector<1x16xf32> to vector<128x16xf32>
    %35 = arith.mulf %30, %34 : vector<128x16xf32>
    %36 = arith.select %32, %30, %35 : vector<128x16xi1>, vector<128x16xf32>
    %37 = vector.shape_cast %36 : vector<128x16xf32> to vector<8x16x16xf32>
    %38 = vector.extract_strided_slice %37 {offsets = [0, 0, 0], sizes = [8, 16, 8], strides = [1, 1, 1]} : vector<8x16x16xf32> to vector<8x16x8xf32>
    %39 = vector.extract_strided_slice %37 {offsets = [0, 0, 8], sizes = [8, 16, 8], strides = [1, 1, 1]} : vector<8x16x16xf32> to vector<8x16x8xf32>
    %40 = vector.shape_cast %38 : vector<8x16x8xf32> to vector<8x1x16x8xf32>
    %41 = vector.shape_cast %39 : vector<8x16x8xf32> to vector<8x1x16x8xf32>
    %42 = tpu.concatenate %40, %41 in 1 : vector<8x1x16x8xf32>, vector<8x1x16x8xf32> -> vector<8x2x16x8xf32>
    %43 = vector.shape_cast %42 : vector<8x2x16x8xf32> to vector<16x16x8xf32>
    %c0_22 = arith.constant 0 : index
    %c0_23 = arith.constant 0 : index
    %c0_24 = arith.constant 0 : index
    %c0_25 = arith.constant 0 : index
    %44 = vector.load %arg6[%c0_22, %c0_23, %c0_24, %c0_25] : memref<1x16x16x8xf32, #tpu.memory_space<vmem>>, vector<1x16x16x8xf32>
    %45 = vector.shape_cast %44 : vector<1x16x16x8xf32> to vector<16x16x8xf32>
    %46 = vector.shape_cast %43 : vector<16x16x8xf32> to vector<1x16x16x8xf32>
    tpu.vector_store %arg6[%c0_22, %c0_23, %c0_24, %c0_25], %46 {strides = array<i32>} : memref<1x16x16x8xf32, #tpu.memory_space<vmem>>, vector<1x16x16x8xf32>,
    return
  }
  func.func @transform_0(%arg0: i32, %arg1: i32) -> (i32, i32, i32, i32) {
    %c0_i32 = arith.constant 0 : i32
    %c0_i32_0 = arith.constant 0 : i32
    %c0_i32_1 = arith.constant 0 : i32
    %c0_i32_2 = arith.constant 0 : i32
    return %arg0, %c0_i32, %c0_i32_0, %c0_i32_1 : i32, i32, i32, i32
  }
  func.func @transform_1(%arg0: i32, %arg1: i32) -> (i32, i32, i32) {
    %c0_i32 = arith.constant 0 : i32
    %c0_i32_0 = arith.constant 0 : i32
    %c0_i32_1 = arith.constant 0 : i32
    %c0_i32_2 = arith.constant 0 : i32
    return %c0_i32, %c0_i32_0, %c0_i32_1 : i32, i32, i32
  }
  func.func @transform_2(%arg0: i32, %arg1: i32) -> (i32, i32) {
    %c0_i32 = arith.constant 0 : i32
    %c0_i32_0 = arith.constant 0 : i32
    %c0_i32_1 = arith.constant 0 : i32
    return %c0_i32, %c0_i32_0 : i32, i32
  }
  func.func @transform_3(%arg0: i32, %arg1: i32) -> (i32, i32) {
    %c0_i32 = arith.constant 0 : i32
    %c0_i32_0 = arith.constant 0 : i32
    %c0_i32_1 = arith.constant 0 : i32
    return %c0_i32, %c0_i32_0 : i32, i32
  }
  func.func @transform_4(%arg0: i32, %arg1: i32) -> (i32, i32, i32, i32) {
    %c0_i32 = arith.constant 0 : i32
    %c0_i32_0 = arith.constant 0 : i32
    %c0_i32_1 = arith.constant 0 : i32
    return %arg0, %arg1, %c0_i32, %c0_i32_0 : i32, i32, i32, i32
  }
}

</mosaic_0001>

<bundles_post_ra>
// kernel: tpu_custom_call.1
= control target key start
LH: loop header
LB: loop body
LE: loop exit
PB: predicated region body
PF: predicated region fallthrough
CT: control target
= control target key end

     0   :  { %s1458_s15 = smov 0   ;;  %s1460_s16 = smov 0   ;;  %s1707_s0 = inlined_call_operand.vmem [shape: bf16[2,18,16,12], index: 0, kind: input, shape index: {}]   ;;  %s1708_s1 = inlined_call_operand.vmem [shape: bf16[3,12,16], index: 1, kind: input, shape index: {}]   ;;  %s1709_s2 = inlined_call_operand.vmem [shape: f32[1,16], index: 2, kind: input, shape index: {}]   ;;  %s1710_s3 = inlined_call_operand.vmem [shape: f32[1,16], index: 3, kind: input, shape index: {}]   ;;  %s1711_s4 = inlined_call_operand.vmem [shape: f32[2,32,16,8], index: 4, kind: output, shape index: {}]  }
   0x1   :  { %s1462_s17 = smov 0   ;;  %s1464_s18 = smov 0  }
   0x2   :  { %s1466_s19 = smov 0  }
   0x3 LB: > { %s23_s20 = sadd.s32 1, %s1422_s17  ;;  %s26_s21 = sadd.s32 1, %s1426_s18  ;;  %s1430_s19 = sphi %s1466_s19, %s14_s19   ;;  %s1426_s18 = sphi %s1464_s18, %s1715_s18   ;;  %s1422_s17 = sphi %s1462_s17, %s1714_s17   ;;  %s1418_s16 = sphi %s1460_s16, %s1713_s16   ;;  %s1414_s15 = sphi %s1458_s15, %s1712_s15  }
   0x4   : > { %p24_p0 = scmp.ge.s32.totalorder %s23_s20, 2  ;;  %p1096_p1 = scmp.ge.s32.totalorder %s1430_s19, 1 }
   0x5   : > { %p176_p2 = scmp.lt.s32.totalorder %s1430_s19, 5 }
   0x6   : > { %s1717_s20 = smov (%p24_p0, %s23_s20), 0  ;;  %s1719_s21 = smov (!%p24_p0, %s26_s21), %s1426_s18 }
   0x7   : > { %p177_p3 = pnand %p1096_p1, %p176_p2  ;;  %p28_p4 = scmp.ge.s32.totalorder %s1719_s21, 2 }
   0x8   : > { %v1365_v0 = vld [vmem:[%s1708_s1 + $0x8] sm:$0x3f] (!%p177_p3)   ;;  %vm339_vm0 = vcmask (!%p177_p3), 1045504   ;;  %p207_p5 = scmp.lt.s32.totalorder (!%p177_p3), %s1418_s16, 1  ;;  %v1366_v1 = vld [vmem:[%s1708_s1] sm:$0x3f] (!%p177_p3)  }
   0x9   : > { %s1721_s21 = smov (%p28_p4, %s1719_s21), 0  ;;  %180 = sbr.rel (%p177_p3) target bundleno = 405 (0x195), region = 36 }
   0xa   : > { %1319 = vmatprep.subr.msk.bf16.mxu1 (!%p177_p3), %vm339_vm0, %v1365_v0  ;;  %v341_v2 = vsel (!%p177_p3), %vm339_vm0, %v1365_v0, 0  ;;  %1320 = vmatprep.subr.msk.bf16.mxu0 (!%p177_p3), %vm339_vm0, %v1366_v1  ;;  %v510_v3 = vsel (!%p177_p3), %vm339_vm0, %v1366_v1, 0  ;;  %v1369_v4 = vld [vmem:[%s1708_s1 + $0x10] sm:$0x3f] (!%p177_p3)   ;;  %s1201_s29 = sshll.u32 (!%p177_p3), %s1414_s15, 6  ;;  %vm314_vm1 = vcmask (!%p177_p3), 97280  }
   0xb   : > { %1232 = vmatpush3.bf16.msra.mxu1 (!%p177_p3), %v341_v2  ;;  %1250 = vmatpush3.bf16.msra.mxu0 (!%p177_p3), %v510_v3  ;;  %v702_v9 = vsel (!%p177_p3), %vm339_vm0, %v1369_v4, 0  ;;  %s1098_s8 = sshll.u32 (!%p177_p3), %s1414_s15, 4  ;;  %v1568_v39 = vld [vmem:[%s1709_s2] ss:$0 sm:$0xff] (!%p177_p3)  ;;  %vm959_vm3 = vcmask (!%p177_p3), 64512   ;;  %s1432_s25 = smov (!%p177_p3), 120  }
   0xc   : > { %1321 = vmatprep.subr.msk.bf16.mxu1 (!%p177_p3), %vm339_vm0, %v1366_v1  ;;  %1322 = vmatprep.subr.msk.bf16.mxu0 (!%p177_p3), %vm339_vm0, %v1369_v4  ;;  %p215_p6 = scmp.lt.s32.totalorder (!%p177_p3), %s1098_s8, 31  ;;  %v1573_v44 = vld [vmem:[%s1710_s3] ss:$0 sm:$0xff] (!%p177_p3) }
  0x10   : > { %s1723_s16 = smov (!%p207_p5, %s1418_s16), 1  ;;  %s1725_s8 = smov (!%p215_p6, %s1098_s8), 31 }
  0x11   : > { %s1323_s28 = smul.u32 144, %s1723_s16  ;;  %s1099_s9 = sshll.u32 %s1725_s8, 1 }
  0x12   : > { %s1100_s10 = sshll.u32 %s1723_s16, 6 }
  0x13   : > { %s211_s6 = scalar_lea.vmem %s1707_s0, %s1323_s28  ;;  %s219_s11 = sadd.s32 %s1100_s10, %s1099_s9 }
  0x14   : > { %s1512_s7 = scalar_lea.vmem %s211_s6, %s1201_s29  ;;  %s1101_s14 = sshll.u32 %s219_s11, 3 }
  0x15   : > { %v1367_v5 = vld [vmem:[%s1512_s7 + $0x8] sm:$0xff]   ;;  %v1368_v6 = vld [vmem:[%s1512_s7] sm:$0xff]   ;;  %v1370_v7 = vld [vmem:[%s1512_s7 + $0x10] sm:$0xff]   ;;  %s1581_s24 = scalar_lea.vmem %s1711_s4, %s1101_s14 }
  0x16   : > { %1233 = vmatprep.mubr.msk.bf16.mxu1 %vm314_vm1, %v1367_v5  ;;  %1251 = vmatprep.mubr.msk.bf16.mxu0 %vm314_vm1, %v1368_v6  ;;  %v1371_v8 = vld [vmem:[%s1512_s7 + $0x8] sm:$0xff]   ;;  %v1372_v10 = vld [vmem:[%s1512_s7 + $0x18] sm:$0xff]   ;;  %v1373_v11 = vld [vmem:[%s1512_s7 + $0x10] sm:$0xff]  }
  0x17   : > { %1234 = vmatmul.mubr.msk.bf16.vlgmr.msra.gmra.mrb[0].mxu1 %vm314_vm1, %v1370_v7  ;;  %1252 = vmatmul.mubr.msk.bf16.vlgmr.msra.gmra.mrb[0].mxu0 %vm314_vm1, %v1371_v8  ;;  %v1374_v12 = vld [vmem:[%s1512_s7 + $0x20] sm:$0xff]   ;;  %v1375_v13 = vld [vmem:[%s1512_s7 + $0x18] sm:$0xff]   ;;  %v1376_v14 = vld [vmem:[%s1512_s7 + $0x28] sm:$0xff]  }
  0x18   : > { %1286 = vmatpush3.bf16.msra.mxu1 %v510_v3  ;;  %1268 = vmatpush3.bf16.msra.mxu0 %v702_v9  ;;  %v1377_v15 = vld [vmem:[%s1512_s7 + $0x10] sm:$0xff]   ;;  %v1379_v17 = vld [vmem:[%s1512_s7 + $0x18] sm:$0xff]   ;;  %v1381_v19 = vld [vmem:[%s1512_s7 + $0x20] sm:$0xff]  }
  0x19   : > { %1237 = vmatprep.mubr.msk.bf16.mxu1 %vm314_vm1, %v1372_v10  ;;  %1255 = vmatprep.mubr.msk.bf16.mxu0 %vm314_vm1, %v1373_v11  ;;  %v1378_v16 = vld [vmem:[%s1512_s7 + $0x30] sm:$0xff]   ;;  %v1380_v18 = vld [vmem:[%s1512_s7 + $0x38] sm:$0xff]   ;;  %v1382_v20 = vld [vmem:[%s1512_s7 + $0x40] sm:$0xff]  }
  0x1a   : > { %v1383_v21 = vld [vmem:[%s1512_s7 + $0x28] sm:$0xff]   ;;  %v1384_v22 = vld [vmem:[%s1512_s7 + $0x20] sm:$0xff]   ;;  %v1385_v23 = vld [vmem:[%s1512_s7 + $0x30] sm:$0xff]  }
  0x1b   : > { %v1386_v24 = vld [vmem:[%s1512_s7 + $0x28] sm:$0xff]   ;;  %v1387_v25 = vld [vmem:[%s1512_s7 + $0x38] sm:$0xff]   ;;  %v1388_v26 = vld [vmem:[%s1512_s7 + $0x30] sm:$0xff]  }
  0x1c   : > { %v1389_v27 = vld [vmem:[%s1512_s7 + $0x40] sm:$0xff]   ;;  %v1390_v28 = vld [vmem:[%s1512_s7 + $0x38] sm:$0xff]   ;;  %v1391_v29 = vld [vmem:[%s1512_s7 + $0x48] sm:$0xff]  }
  0x1f   : > { %1238 = vmatmul.mubr.msk.bf16.gmra.mrb[4].mxu1 %vm314_vm1, %v1374_v12  ;;  %1256 = vmatmul.mubr.msk.bf16.gmra.mrb[4].mxu0 %vm314_vm1, %v1375_v13 }
  0x20   : > { %1241 = vmatprep.mubr.msk.bf16.mxu1 %vm314_vm1, %v1376_v14  ;;  %1269 = vmatprep.mubr.msk.bf16.mxu0 %vm314_vm1, %v1377_v15 }
  0x27   : > { %1242 = vmatmul.mubr.msk.bf16.gmra.mrb[8].mxu1 %vm314_vm1, %v1378_v16  ;;  %1270 = vmatmul.mubr.msk.bf16.vlgmr.msra.gmra.mrb[0].mxu0 %vm314_vm1, %v1379_v17 }
  0x28   : > { %1245 = vmatprep.mubr.msk.bf16.mxu1 %vm314_vm1, %v1380_v18  ;;  %1273 = vmatprep.mubr.msk.bf16.mxu0 %vm314_vm1, %v1381_v19 }
  0x2f   : > { %1246 = vmatmul.mubr.msk.bf16.gmra.mrb[12].mxu1 %vm314_vm1, %v1382_v20  ;;  %1274 = vmatmul.mubr.msk.bf16.gmra.mrb[4].mxu0 %vm314_vm1, %v1383_v21 }
  0x30   : > { %1259 = vmatprep.mubr.msk.bf16.mxu1 %vm314_vm1, %v1384_v22  ;;  %1277 = vmatprep.mubr.msk.bf16.mxu0 %vm314_vm1, %v1385_v23 }
  0x37   : > { %1260 = vmatmul.mubr.msk.bf16.vlgmr.msra.gmra.mrb[8].mxu1 %vm314_vm1, %v1386_v24  ;;  %1278 = vmatmul.mubr.msk.bf16.gmra.mrb[8].mxu0 %vm314_vm1, %v1387_v25 }
  0x38   : > { %1263 = vmatprep.mubr.msk.bf16.mxu1 %vm314_vm1, %v1388_v26  ;;  %1281 = vmatprep.mubr.msk.bf16.mxu0 %vm314_vm1, %v1389_v27 }
  0x3f   : > { %1264 = vmatmul.mubr.msk.bf16.gmra.mrb[12].mxu1 %vm314_vm1, %v1390_v28  ;;  %1282 = vmatmul.mubr.msk.bf16.gmra.mrb[12].mxu0 %vm314_vm1, %v1391_v29 }
  0xea   : > { %v1235_v30 = vpop.f32.mrb[0].mxu1 }
  0xeb   : > { %v377_v31 = vpop.f32.mrb[1].mxu1 }
  0xec   : > { %v1236_v32 = vpop.f32.mrb[2].mxu1 }
  0xed   : > { %v380_v33 = vpop.f32.mrb[3].mxu1 }
  0xf2   : > { %v1239_v34 = vpop.f32.mrb[4].mxu1 }
  0xf3   : > { %v393_v35 = vpop.f32.mrb[5].mxu1 }
  0xf4   : > { %v1240_v36 = vpop.f32.mrb[6].mxu1 }
  0xf5   : > { %v396_v37 = vpop.f32.mrb[7].mxu1 }
  0xfa   : > { %v1271_v38 = vpop.f32.mrb[0].mxu0 }
  0xfb   : > { %v1287_v40 = vadd.f32 %v1271_v38, %v1235_v30  ;;  %v738_v41 = vpop.f32.mrb[1].mxu0 }
  0xfc   : > { %v1288_v42 = vadd.f32 %v738_v41, %v377_v31  ;;  %v1272_v43 = vpop.f32.mrb[2].mxu0 }
  0xfd   : > { %v826_v45 = vadd.f32 %v1287_v40, %v1568_v39  ;;  %v1289_v46 = vadd.f32 %v1272_v43, %v1236_v32  ;;  %v741_v47 = vpop.f32.mrb[3].mxu0 }
  0xfe   : > { %v824_v48 = vadd.f32 %v1288_v42, %v1568_v39  ;;  %v1290_v49 = vadd.f32 %v741_v47, %v380_v33 }
  0xff   : > { %v827_v50 = vadd.f32 %v1289_v46, %v1568_v39  ;;  %vm842_vm2 = vcmp.gt.f32.partialorder %v826_v45, 0.0  ;;  %v865_v51 = vmul.f32 %v1573_v44, %v826_v45 }
 0x100   : > { %v825_v52 = vadd.f32 %v1290_v49, %v1568_v39  ;;  %vm840_vm4 = vcmp.gt.f32.partialorder %v824_v48, 0.0  ;;  %v863_v53 = vmul.f32 %v1573_v44, %v824_v48 }
 0x101   : > { %v881_v54 = vsel %vm842_vm2, %v826_v45, %v865_v51  ;;  %vm843_vm5 = vcmp.gt.f32.partialorder %v827_v50, 0.0  ;;  %v866_v55 = vmul.f32 %v1573_v44, %v827_v50 }
 0x102   : > { %915 = vrot.lane.b32.xlu1 %v881_v54, %s1432_s25  ;;  %964 = vst.msk [vmem:[%s1581_s24 + $0x20] sm:$0xff] %vm959_vm3, %v881_v54  ;;  %v1275_v56 = vpop.f32.mrb[4].mxu0  ;;  %v879_v57 = vsel %vm840_vm4, %v824_v48, %v863_v53  ;;  %vm841_vm6 = vcmp.gt.f32.partialorder %v825_v52, 0.0  ;;  %v864_v58 = vmul.f32 %v1573_v44, %v825_v52 }
 0x103   : > { %v1291_v59 = vadd.f32 %v1275_v56, %v1239_v34  ;;  %911 = vrot.lane.b32.xlu0 %v879_v57, %s1432_s25  ;;  %960 = vst.msk [vmem:[%s1581_s24] sm:$0xff] %vm959_vm3, %v879_v57  ;;  %v754_v60 = vpop.f32.mrb[5].mxu0  ;;  %v882_v61 = vsel %vm843_vm5, %v827_v50, %v866_v55 }
 0x104   : > { %v1292_v62 = vadd.f32 %v754_v60, %v393_v35  ;;  %v1276_v63 = vpop.f32.mrb[6].mxu0  ;;  %965 = vst.msk [vmem:[%s1581_s24 + $0x28] sm:$0xff] %vm959_vm3, %v882_v61  ;;  %v880_v0 = vsel %vm841_vm6, %v825_v52, %v864_v58 }
 0x105   : > { %v830_v1 = vadd.f32 %v1291_v59, %v1568_v39  ;;  %v1293_v2 = vadd.f32 %v1276_v63, %v1240_v36  ;;  %v757_v3 = vpop.f32.mrb[7].mxu0  ;;  %961 = vst.msk [vmem:[%s1581_s24 + $0x8] sm:$0xff] %vm959_vm3, %v880_v0 }
 0x106   : > { %v828_v4 = vadd.f32 %v1292_v62, %v1568_v39  ;;  %v1294_v5 = vadd.f32 %v757_v3, %v396_v37  ;;  %917 = vrot.lane.b32.xlu1 %v882_v61, %s1432_s25 }
 0x107   : > { %v831_v6 = vadd.f32 %v1293_v2, %v1568_v39  ;;  %913 = vrot.lane.b32.xlu0 %v880_v0, %s1432_s25  ;;  %vm846_vm7 = vcmp.gt.f32.partialorder %v830_v1, 0.0  ;;  %v869_v7 = vmul.f32 %v1573_v44, %v830_v1 }
 0x108   : > { %v829_v8 = vadd.f32 %v1294_v5, %v1568_v39  ;;  %vm844_vm8 = vcmp.gt.f32.partialorder %v828_v4, 0.0  ;;  %v867_v9 = vmul.f32 %v1573_v44, %v828_v4 }
 0x109   : > { %v885_v11 = vsel %vm846_vm7, %v830_v1, %v869_v7  ;;  %vm847_vm9 = vcmp.gt.f32.partialorder %v831_v6, 0.0  ;;  %v870_v12 = vmul.f32 %v1573_v44, %v831_v6 }
 0x10a   : > { %v1261_v10 = vpop.f32.mrb[8].mxu1  ;;  %v1279_v13 = vpop.f32.mrb[8].mxu0  ;;  %972 = vst.msk [vmem:[%s1581_s24 + $0x60] sm:$0xff] %vm959_vm3, %v885_v11  ;;  %v883_v15 = vsel %vm844_vm8, %v828_v4, %v867_v9  ;;  %vm845_vm10 = vcmp.gt.f32.partialorder %v829_v8, 0.0  ;;  %v868_v16 = vmul.f32 %v1573_v44, %v829_v8 }
 0x10b   : > { %v578_v14 = vpop.f32.mrb[9].mxu1  ;;  %v1295_v17 = vadd.f32 %v1279_v13, %v1261_v10  ;;  %923 = vrot.lane.b32.xlu0 %v885_v11, %s1432_s25  ;;  %v770_v18 = vpop.f32.mrb[9].mxu0  ;;  %v886_v20 = vsel %vm847_vm9, %v831_v6, %v870_v12  ;;  %968 = vst.msk [vmem:[%s1581_s24 + $0x40] sm:$0xff] %vm959_vm3, %v883_v15 }
 0x10c   : > { %v1262_v19 = vpop.f32.mrb[10].mxu1  ;;  %v1296_v21 = vadd.f32 %v770_v18, %v578_v14  ;;  %925 = vrot.lane.b32.xlu1 %v886_v20, %s1432_s25  ;;  %973 = vst.msk [vmem:[%s1581_s24 + $0x68] sm:$0xff] %vm959_vm3, %v886_v20  ;;  %v1280_v22 = vpop.f32.mrb[10].mxu0  ;;  %v884_v24 = vsel %vm845_vm10, %v829_v8, %v868_v16 }
 0x10d   : > { %v581_v23 = vpop.f32.mrb[11].mxu1  ;;  %v834_v25 = vadd.f32 %v1295_v17, %v1568_v39  ;;  %v1297_v26 = vadd.f32 %v1280_v22, %v1262_v19  ;;  %v773_v27 = vpop.f32.mrb[11].mxu0  ;;  %969 = vst.msk [vmem:[%s1581_s24 + $0x48] sm:$0xff] %vm959_vm3, %v884_v24 }
 0x10e   : > { %v832_v28 = vadd.f32 %v1296_v21, %v1568_v39  ;;  %v1298_v29 = vadd.f32 %v773_v27, %v581_v23 }
 0x10f   : > { %v835_v30 = vadd.f32 %v1297_v26, %v1568_v39  ;;  %919 = vrot.lane.b32.xlu0 %v883_v15, %s1432_s25  ;;  %vm850_vm11 = vcmp.gt.f32.partialorder %v834_v25, 0.0  ;;  %v873_v31 = vmul.f32 %v1573_v44, %v834_v25 }
 0x110   : > { %v833_v32 = vadd.f32 %v1298_v29, %v1568_v39  ;;  %921 = vrot.lane.b32.xlu1 %v884_v24, %s1432_s25  ;;  %vm848_vm12 = vcmp.gt.f32.partialorder %v832_v28, 0.0  ;;  %v871_v33 = vmul.f32 %v1573_v44, %v832_v28 }
 0x111   : > { %v889_v35 = vsel %vm850_vm11, %v834_v25, %v873_v31  ;;  %vm851_vm13 = vcmp.gt.f32.partialorder %v835_v30, 0.0  ;;  %v874_v36 = vmul.f32 %v1573_v44, %v835_v30 }
 0x112   : > { %v1265_v34 = vpop.f32.mrb[12].mxu1  ;;  %v1283_v37 = vpop.f32.mrb[12].mxu0  ;;  %980 = vst.msk [vmem:[%s1581_s24 + $0xa0] sm:$0xff] %vm959_vm3, %v889_v35  ;;  %v887_v40 = vsel %vm848_vm12, %v832_v28, %v871_v33  ;;  %vm849_vm14 = vcmp.gt.f32.partialorder %v833_v32, 0.0  ;;  %v872_v41 = vmul.f32 %v1573_v44, %v833_v32 }
 0x113   : > { %v594_v38 = vpop.f32.mrb[13].mxu1  ;;  %v1299_v42 = vadd.f32 %v1283_v37, %v1265_v34  ;;  %931 = vrot.lane.b32.xlu0 %v889_v35, %s1432_s25  ;;  %v786_v43 = vpop.f32.mrb[13].mxu0  ;;  %v890_v46 = vsel %vm851_vm13, %v835_v30, %v874_v36  ;;  %976 = vst.msk [vmem:[%s1581_s24 + $0x80] sm:$0xff] %vm959_vm3, %v887_v40 }
 0x114   : > { %v1266_v45 = vpop.f32.mrb[14].mxu1  ;;  %v1300_v47 = vadd.f32 %v786_v43, %v594_v38  ;;  %933 = vrot.lane.b32.xlu1 %v890_v46, %s1432_s25  ;;  %981 = vst.msk [vmem:[%s1581_s24 + $0xa8] sm:$0xff] %vm959_vm3, %v890_v46  ;;  %v1284_v48 = vpop.f32.mrb[14].mxu0  ;;  %v888_v50 = vsel %vm849_vm14, %v833_v32, %v872_v41 }
 0x115   : > { %v597_v49 = vpop.f32.mrb[15].mxu1  ;;  %v838_v51 = vadd.f32 %v1299_v42, %v1568_v39  ;;  %v1301_v52 = vadd.f32 %v1284_v48, %v1266_v45  ;;  %v789_v53 = vpop.f32.mrb[15].mxu0  ;;  %977 = vst.msk [vmem:[%s1581_s24 + $0x88] sm:$0xff] %vm959_vm3, %v888_v50 }
 0x116   : > { %v836_v54 = vadd.f32 %v1300_v47, %v1568_v39  ;;  %v1302_v55 = vadd.f32 %v789_v53, %v597_v49 }
 0x117   : > { %v839_v56 = vadd.f32 %v1301_v52, %v1568_v39  ;;  %927 = vrot.lane.b32.xlu0 %v887_v40, %s1432_s25  ;;  %vm854_vm15 = vcmp.gt.f32.partialorder %v838_v51, 0.0  ;;  %v877_v57 = vmul.f32 %v1573_v44, %v838_v51 }
 0x118   : > { %v837_v58 = vadd.f32 %v1302_v55, %v1568_v39  ;;  %929 = vrot.lane.b32.xlu1 %v888_v50, %s1432_s25  ;;  %vm852_vm0 = vcmp.gt.f32.partialorder %v836_v54, 0.0  ;;  %v875_v59 = vmul.f32 %v1573_v44, %v836_v54 }
 0x119   : > { %v893_v60 = vsel %vm854_vm15, %v838_v51, %v877_v57  ;;  %vm855_vm1 = vcmp.gt.f32.partialorder %v839_v56, 0.0  ;;  %v878_v61 = vmul.f32 %v1573_v44, %v839_v56 }
 0x11a   : > { %v891_v62 = vsel %vm852_vm0, %v836_v54, %v875_v59  ;;  %vm853_vm2 = vcmp.gt.f32.partialorder %v837_v58, 0.0  ;;  %v876_v63 = vmul.f32 %v1573_v44, %v837_v58  ;;  %988 = vst.msk [vmem:[%s1581_s24 + $0xe0] sm:$0xff] %vm959_vm3, %v893_v60 }
 0x11b   : > { %935 = vrot.lane.b32.xlu0 %v891_v62, %s1432_s25  ;;  %984 = vst.msk [vmem:[%s1581_s24 + $0xc0] sm:$0xff] %vm959_vm3, %v891_v62  ;;  %v894_v39 = vsel %vm855_vm1, %v839_v56, %v878_v61 }
 0x11c   : > { %v892_v0 = vsel %vm853_vm2, %v837_v58, %v876_v63  ;;  %989 = vst.msk [vmem:[%s1581_s24 + $0xe8] sm:$0xff] %vm959_vm3, %v894_v39 }
 0x11d   : > { %937 = vrot.lane.b32.xlu1 %v892_v0, %s1432_s25  ;;  %985 = vst.msk [vmem:[%s1581_s24 + $0xc8] sm:$0xff] %vm959_vm3, %v892_v0 }
 0x11f   : > { %939 = vrot.lane.b32.xlu0 %v893_v60, %s1432_s25 }
 0x121   : > { %941 = vrot.lane.b32.xlu1 %v894_v39, %s1432_s25 }
 0x174   : > { %v916_v44 = vpop.permute.xlu1 %915 }
 0x175   : > { %966 = vst.msk [vmem:[%s1581_s24 + $0x30] sm:$0xff] %vm959_vm3, %v916_v44  ;;  %v912_v1 = vpop.permute.xlu0 %911 }
 0x176   : > { %962 = vst.msk [vmem:[%s1581_s24 + $0x10] sm:$0xff] %vm959_vm3, %v912_v1 }
 0x178   : > { %v918_v2 = vpop.permute.xlu1 %917 }
 0x179   : > { %967 = vst.msk [vmem:[%s1581_s24 + $0x38] sm:$0xff] %vm959_vm3, %v918_v2  ;;  %v914_v3 = vpop.permute.xlu0 %913 }
 0x17a   : > { %963 = vst.msk [vmem:[%s1581_s24 + $0x18] sm:$0xff] %vm959_vm3, %v914_v3 }
 0x17d   : > { %v924_v4 = vpop.permute.xlu0 %923 }
 0x17e   : > { %974 = vst.msk [vmem:[%s1581_s24 + $0x70] sm:$0xff] %vm959_vm3, %v924_v4  ;;  %v926_v5 = vpop.permute.xlu1 %925 }
 0x17f   : > { %975 = vst.msk [vmem:[%s1581_s24 + $0x78] sm:$0xff] %vm959_vm3, %v926_v5 }
 0x181   : > { %v920_v6 = vpop.permute.xlu0 %919 }
 0x182   : > { %970 = vst.msk [vmem:[%s1581_s24 + $0x50] sm:$0xff] %vm959_vm3, %v920_v6  ;;  %v922_v7 = vpop.permute.xlu1 %921 }
 0x183   : > { %971 = vst.msk [vmem:[%s1581_s24 + $0x58] sm:$0xff] %vm959_vm3, %v922_v7 }
 0x185   : > { %v932_v8 = vpop.permute.xlu0 %931 }
 0x186   : > { %982 = vst.msk [vmem:[%s1581_s24 + $0xb0] sm:$0xff] %vm959_vm3, %v932_v8  ;;  %v934_v9 = vpop.permute.xlu1 %933 }
 0x187   : > { %983 = vst.msk [vmem:[%s1581_s24 + $0xb8] sm:$0xff] %vm959_vm3, %v934_v9 }
 0x189   : > { %v928_v10 = vpop.permute.xlu0 %927 }
 0x18a   : > { %978 = vst.msk [vmem:[%s1581_s24 + $0x90] sm:$0xff] %vm959_vm3, %v928_v10  ;;  %v930_v11 = vpop.permute.xlu1 %929 }
 0x18b   : > { %979 = vst.msk [vmem:[%s1581_s24 + $0x98] sm:$0xff] %vm959_vm3, %v930_v11 }
 0x18d   : > { %v936_v12 = vpop.permute.xlu0 %935 }
 0x18e   : > { %986 = vst.msk [vmem:[%s1581_s24 + $0xd0] sm:$0xff] %vm959_vm3, %v936_v12 }
 0x18f   : > { %v938_v13 = vpop.permute.xlu1 %937 }
 0x190   : > { %987 = vst.msk [vmem:[%s1581_s24 + $0xd8] sm:$0xff] %vm959_vm3, %v938_v13 }
 0x191   : > { %v940_v14 = vpop.permute.xlu0 %939 }
 0x192   : > { %990 = vst.msk [vmem:[%s1581_s24 + $0xf0] sm:$0xff] %vm959_vm3, %v940_v14 }
 0x193   : > { %v942_v15 = vpop.permute.xlu1 %941 }
 0x194   : > { %991 = vst.msk [vmem:[%s1581_s24 + $0xf8] sm:$0xff] %vm959_vm3, %v942_v15 }
 0x195 PF: > { %s14_s19 = sadd.s32 1, %s1430_s19   ;;  %s1712_s15 = smov %s1422_s17 }
 0x196   : > { %p11_p7 = scmp.ge.s32.totalorder %s14_s19, 6   ;;  %s1713_s16 = smov %s1426_s18 }
 0x197   : > { %s1714_s17 = smov %s1717_s20  ;;  %s1715_s18 = smov %s1721_s21 }
 0x198   :  { %13 = sbr.rel (!%p11_p7) target bundleno = 3 (0x3), region = 71 }

</bundles_post_ra>
